<compile_context>
chip_gen: v6e
topology: v6e:2x2x1
jax: 0.10.0
libtpu: 0.0.40
codegen_flags: <defaults>
</compile_context>

<pallas_src>
import functools

import jax
import jax.numpy as jnp
from jax.experimental import pallas as pl
from jax.experimental.pallas import tpu as pltpu


# ----------------------------------------------------------------------------
# Kernel
# ----------------------------------------------------------------------------
def encoder_block_kernel(x_ref, wqkv_ref, bqkv_ref, wo_ref, bo_ref,
                         w1_ref, b1_ref, w2_ref, b2_ref,
                         g1_ref, beta1_ref, g2_ref, beta2_ref,
                         o_ref, *, num_heads):
    """One (batch-tile, layer) grid step; activation carried in o_ref across layers."""
    layer = pl.program_id(1)
    Bt, S, E = o_ref.shape
    H = num_heads
    D = E // H
    R = Bt * S

    # Seed the resident (bf16) activation from the kernel input on the first layer.
    @pl.when(layer == 0)
    def _():
        o_ref[...] = x_ref[...]

    x_bf = o_ref[...].reshape(R, E)                      # (R, E) bf16
    xf = x_bf.astype(jnp.float32)                        # f32 copy for residual/LN math

    # --- fused QKV projection: ONE lane-dense matmul (R, E) @ (E, 3E) ----------------
    qkv = jnp.dot(x_bf, wqkv_ref[...],
                  preferred_element_type=jnp.float32) + bqkv_ref[...]   # (R, 3E) f32
    qkv = qkv.astype(jnp.bfloat16)

    # --- attention --------------------------------------------------------------------
    # Per-head score / PV contractions are inherently (S,D)x(D,S) / (S,S)x(S,D); a short
    # static head loop of 3-D batched einsums (batch dim = Bt) keeps M = Bt*S on the MXU
    # while avoiding lane-splitting reshapes / 4-D transposes.
    # TODO(synk): switch to an online-softmax K/V-tile loop for S >= ~512.
    ctx_heads = []
    for h in range(H):
        qh = qkv[:, h * D:(h + 1) * D].reshape(Bt, S, D)            # 1/sqrt(D) folded in W
        kh = qkv[:, E + h * D:E + (h + 1) * D].reshape(Bt, S, D)
        vh = qkv[:, 2 * E + h * D:2 * E + (h + 1) * D].reshape(Bt, S, D)
        s = jnp.einsum('bqd,bkd->bqk', qh, kh,
                       preferred_element_type=jnp.float32)          # (Bt, S, S) f32
        m = jnp.max(s, axis=-1, keepdims=True)
        e = jnp.exp(s - m)
        p = e * pl.reciprocal(jnp.sum(e, axis=-1, keepdims=True), approx=True)
        ch = jnp.einsum('bqk,bkd->bqd', p.astype(jnp.bfloat16), vh,
                        preferred_element_type=jnp.float32)         # (Bt, S, D)
        ctx_heads.append(ch.reshape(R, D))
    ctx = jnp.concatenate(ctx_heads, axis=-1)                       # (R, E), head-major cols

    # --- fused output projection: head-sum happens inside the MXU f32 accumulator ------
    attn = jnp.dot(ctx.astype(jnp.bfloat16), wo_ref[...],
                   preferred_element_type=jnp.float32) + bo_ref[...]   # (R, E) f32

    def layer_norm(z, g, beta):                                     # f32 math
        mu = jnp.mean(z, axis=-1, keepdims=True)
        d = z - mu
        var = jnp.mean(d * d, axis=-1, keepdims=True)
        return d * jax.lax.rsqrt(var + 1e-5) * g + beta

    # --- residual + LayerNorm 1 ---------------------------------------------------------
    x1 = layer_norm(xf + attn, g1_ref[...], beta1_ref[...])         # (R, E) f32

    # --- feed-forward: Linear -> ReLU -> Linear (bf16 operands, f32 accumulate) ---------
    h1 = jnp.dot(x1.astype(jnp.bfloat16), w1_ref[...],
                 preferred_element_type=jnp.float32) + b1_ref[...]
    h1 = jnp.maximum(h1, 0.0)
    ff = jnp.dot(h1.astype(jnp.bfloat16), w2_ref[...],
                 preferred_element_type=jnp.float32) + b2_ref[...]

    # --- residual + LayerNorm 2; write back the carried activation ----------------------
    y = layer_norm(x1 + ff, g2_ref[...], beta2_ref[...])
    o_ref[...] = y.reshape(Bt, S, E).astype(o_ref.dtype)


# ----------------------------------------------------------------------------
# Wrapper
# ----------------------------------------------------------------------------
def _pick_batch_tile(B, S):
    """Largest Bt dividing B with Bt*S <= ~256 rows; prefer >= 2 batch tiles so both
    v7x TensorCores get work (v5e/v6e have a single TC, so this costs nothing there)."""
    target_rows = 256
    best = 1
    for bt in range(1, B + 1):
        if B % bt == 0 and bt * S <= max(target_rows, S):
            best = bt
    if B // best < 2:
        for bt in range(best, 0, -1):
            if B % bt == 0 and B // bt >= 2:
                best = bt
                break
    return best


def _vmem_limit_bytes():
    """~56 MiB on 64-MiB (v7x) parts, capped at ~110 MiB on 128-MiB (v5e/v6e) parts."""
    try:
        cap = int(pltpu.get_tpu_info().vmem_capacity_bytes)
    except Exception:
        cap = 64 * 1024 * 1024
    return int(min(cap - 8 * 1024 * 1024, 110 * 1024 * 1024))


def transformer_encoder_block(x_sbe, params, *, num_heads, batch_tile=None):
    """x_sbe: (S, B, E) float32 — PyTorch nn.MultiheadAttention default layout."""
    S, B, E = x_sbe.shape
    H = num_heads
    assert E % H == 0, "embed dim must be divisible by num_heads"
    (wqkv, bqkv, wo, bo, w1, b1, w2, b2, g1, be1, g2, be2) = params
    L = wqkv.shape[0]
    HID = w1.shape[-1]

    Bt = _pick_batch_tile(B, S) if batch_tile is None else batch_tile
    assert B % Bt == 0

    # batch-major, bf16 resident activation (halves activation DMA + VMEM footprint)
    x_bse = jnp.transpose(x_sbe, (1, 0, 2)).astype(jnp.bfloat16)

    def amap(b, l):   # activation / output: batch tile b, constant across the layer axis
        return (b, 0, 0)

    def wmap(b, l):   # stacked per-layer weights / biases / LN params
        return (l, 0, 0)

    in_specs = [
        pl.BlockSpec((Bt, S, E), amap),             # x (bf16)
        pl.BlockSpec((None, E, 3 * E), wmap),       # wqkv (bf16, Q pre-scaled, lane-dense N)
        pl.BlockSpec((None, 1, 3 * E), wmap),       # bqkv (f32, lane-dense row)
        pl.BlockSpec((None, E, E), wmap),           # wo  (bf16)
        pl.BlockSpec((None, 1, E), wmap),           # bo
        pl.BlockSpec((None, E, HID), wmap),         # w1  (bf16)
        pl.BlockSpec((None, 1, HID), wmap),         # b1
        pl.BlockSpec((None, HID, E), wmap),         # w2  (bf16)
        pl.BlockSpec((None, 1, E), wmap),           # b2
        pl.BlockSpec((None, 1, E), wmap),           # ln1 gamma
        pl.BlockSpec((None, 1, E), wmap),           # ln1 beta
        pl.BlockSpec((None, 1, E), wmap),           # ln2 gamma
        pl.BlockSpec((None, 1, E), wmap),           # ln2 beta
    ]
    out_spec = pl.BlockSpec((Bt, S, E), amap)

    # Advisory cost estimate so XLA schedules the wrapper transposes around the kernel.
    flops = int(B * S * L * (8 * E * E + 4 * S * E + 4 * E * HID))
    transcendentals = int(B * H * S * S * L)
    weight_bytes = sum(int(p.size) * p.dtype.itemsize for p in params)
    act_bytes = 2 * int(x_bse.size) * 2
    cost = pl.CostEstimate(flops=flops, transcendentals=transcendentals,
                           bytes_accessed=int(weight_bytes * (B // Bt) + act_bytes))

    kernel = functools.partial(encoder_block_kernel, num_heads=H)
    y_bse = pl.pallas_call(
        kernel,
        out_shape=jax.ShapeDtypeStruct((B, S, E), jnp.bfloat16),
        grid=(B // Bt, L),
        in_specs=in_specs,
        out_specs=out_spec,
        compiler_params=pltpu.CompilerParams(
            dimension_semantics=("parallel", "arbitrary"),
            vmem_limit_bytes=_vmem_limit_bytes()),
        cost_estimate=cost,
    )(x_bse, wqkv, bqkv, wo, bo, w1, b1, w2, b2, g1, be1, g2, be2)

    return jnp.transpose(y_bse, (1, 0, 2)).astype(jnp.float32)


# ----------------------------------------------------------------------------
# Parameters (PyTorch layouts) + host-side repack for the kernel
# ----------------------------------------------------------------------------
def init_torch_params(key, E, H, hidden, num_layers):
    """Synthetic per-layer parameters in PyTorch layouts (all f32)."""
    s = 0.05
    layers = []
    for k in jax.random.split(key, num_layers):
        ks = jax.random.split(k, 8)
        layers.append(dict(
            in_w=jax.random.normal(ks[0], (3 * E, E), jnp.float32) * s,   # in_proj_weight
            in_b=jax.random.normal(ks[1], (3 * E,), jnp.float32) * s,     # in_proj_bias
            out_w=jax.random.normal(ks[2], (E, E), jnp.float32) * s,      # out_proj.weight
            out_b=jax.random.normal(ks[3], (E,), jnp.float32) * s,        # out_proj.bias
            w1=jax.random.normal(ks[4], (hidden, E), jnp.float32) * s,    # linear1.weight
            fb1=jax.random.normal(ks[5], (hidden,), jnp.float32) * s,
            w2=jax.random.normal(ks[6], (E, hidden), jnp.float32) * s,    # linear2.weight
            fb2=jax.random.normal(ks[7], (E,), jnp.float32) * s,
            g1=jnp.ones((E,), jnp.float32), b1=jnp.zeros((E,), jnp.float32),  # LayerNorm1
            g2=jnp.ones((E,), jnp.float32), b2=jnp.zeros((E,), jnp.float32),  # LayerNorm2
        ))
    return layers


def pack_params(torch_layers, E, H):
    """Repack for the kernel: fused lane-dense (E,3E) QKV with 1/sqrt(head_dim) folded
    into Q, (E,E) out-proj (head-sum via MXU K=E), bf16 matmul weights, lane-dense (1,N)
    bias rows, everything stacked across layers on a leading axis."""
    D = E // H
    scale = 1.0 / float(D) ** 0.5
    packed = []
    for lp in torch_layers:
        in_w = lp['in_w'].at[:E].multiply(scale)     # fold softmax scale into Q rows
        in_b = lp['in_b'].at[:E].multiply(scale)
        packed.append((
            in_w.T.astype(jnp.bfloat16),             # (E, 3E)
            in_b[None, :],                           # (1, 3E) f32
            lp['out_w'].T.astype(jnp.bfloat16),      # (E, E)
            lp['out_b'][None, :],                    # (1, E)
            lp['w1'].T.astype(jnp.bfloat16),         # (E, HID)
            lp['fb1'][None, :],                      # (1, HID)
            lp['w2'].T.astype(jnp.bfloat16),         # (HID, E)
            lp['fb2'][None, :],                      # (1, E)
            lp['g1'][None, :], lp['b1'][None, :],
            lp['g2'][None, :], lp['b2'][None, :],
        ))
    return tuple(jnp.stack([lay[i] for lay in packed], axis=0) for i in range(12))


def reference_forward(x, torch_layers, num_heads):
    """Pure-JAX f32 mirror of the PyTorch module (eval mode, no masks, no dropout)."""
    S, B, E = x.shape
    H = num_heads
    D = E // H
    hp = jax.lax.Precision.HIGHEST

    def ln(z, g, b):
        mu = jnp.mean(z, axis=-1, keepdims=True)
        var = jnp.mean((z - mu) ** 2, axis=-1, keepdims=True)
        return (z - mu) * jax.lax.rsqrt(var + 1e-5) * g + b

    def heads(t):
        return t.reshape(S, B * H, D).transpose(1, 0, 2)   # (B*H, S, D)

    for lp in torch_layers:
        qkv = jnp.einsum('sbe,fe->sbf', x, lp['in_w'], precision=hp) + lp['in_b']
        q, k, v = qkv[..., :E], qkv[..., E:2 * E], qkv[..., 2 * E:]
        q, k, v = heads(q) / (D ** 0.5), heads(k), heads(v)
        p = jax.nn.softmax(jnp.einsum('nqd,nkd->nqk', q, k, precision=hp), axis=-1)
        ctx = jnp.einsum('nqk,nkd->nqd', p, v, precision=hp)
        ctx = ctx.transpose(1, 0, 2).reshape(S, B, E)
        attn = jnp.einsum('sbe,fe->sbf', ctx, lp['out_w'], precision=hp) + lp['out_b']
        x = ln(x + attn, lp['g1'], lp['b1'])
        ff = jnp.maximum(jnp.einsum('sbe,he->sbh', x, lp['w1'], precision=hp) + lp['fb1'], 0.0)
        ff = jnp.einsum('sbh,eh->sbe', ff, lp['w2'], precision=hp) + lp['fb2']
        x = ln(x + ff, lp['g2'], lp['b2'])
    return x


if __name__ == "__main__":
    # TransformerEncoderBlock(input_dim=32, num_heads=4, hidden_dim=64, num_layers=2)
    S, B, E, H, HID, L = 8, 2, 32, 4, 64, 2

    root = jax.random.PRNGKey(0)
    x_key, p_key = jax.random.split(root)
    x = jax.random.normal(x_key, (S, B, E), jnp.float32)

    torch_layers = init_torch_params(p_key, E, H, HID, L)
    params = pack_params(torch_layers, E, H)

    out = jax.block_until_ready(transformer_encoder_block(x, params, num_heads=H))

    assert out.shape == (S, B, E)
    assert bool(jnp.all(jnp.isfinite(out)))

    # Loose tolerance: bf16 matmul operands + bf16 resident activation + approx
    # reciprocal in the softmax, compared against the f32 reference.
    ref = reference_forward(x, torch_layers, H)
    max_err = float(jnp.max(jnp.abs(out - ref)))
    assert max_err < 0.15, f"max abs err vs reference = {max_err}"
    print("KERNEL_OK")
</pallas_src>

<mosaic_0001>
module attributes {stable_mosaic.version = 11 : i64} {
  func.func @encoder_block_kernel(%arg0: i32, %arg1: i32, %arg2: memref<1x8x32xbf16, #tpu.memory_space<vmem>>, %arg3: memref<1x32x96xbf16, #tpu.memory_space<vmem>>, %arg4: memref<1x1x96xf32, #tpu.memory_space<vmem>>, %arg5: memref<1x32x32xbf16, #tpu.memory_space<vmem>>, %arg6: memref<1x1x32xf32, #tpu.memory_space<vmem>>, %arg7: memref<1x32x64xbf16, #tpu.memory_space<vmem>>, %arg8: memref<1x1x64xf32, #tpu.memory_space<vmem>>, %arg9: memref<1x64x32xbf16, #tpu.memory_space<vmem>>, %arg10: memref<1x1x32xf32, #tpu.memory_space<vmem>>, %arg11: memref<1x1x32xf32, #tpu.memory_space<vmem>>, %arg12: memref<1x1x32xf32, #tpu.memory_space<vmem>>, %arg13: memref<1x1x32xf32, #tpu.memory_space<vmem>>, %arg14: memref<1x1x32xf32, #tpu.memory_space<vmem>>, %arg15: memref<1x8x32xbf16, #tpu.memory_space<vmem>>) attributes {dimension_semantics = [#tpu.dimension_semantics<parallel>, #tpu.dimension_semantics<arbitrary>], iteration_bounds = array<i64: 2, 2>, scalar_prefetch = 0 : i64, scratch_operands = 0 : i64, tpu.core_type = #tpu.core_type<tc>, window_params = [{transform_indices = @transform_0, window_bounds = array<i64: 1, 8, 32>}, {transform_indices = @transform_1, window_bounds = array<i64: 1, 32, 96>}, {transform_indices = @transform_2, window_bounds = array<i64: 1, 1, 96>}, {transform_indices = @transform_3, window_bounds = array<i64: 1, 32, 32>}, {transform_indices = @transform_4, window_bounds = array<i64: 1, 1, 32>}, {transform_indices = @transform_5, window_bounds = array<i64: 1, 32, 64>}, {transform_indices = @transform_6, window_bounds = array<i64: 1, 1, 64>}, {transform_indices = @transform_7, window_bounds = array<i64: 1, 64, 32>}, {transform_indices = @transform_8, window_bounds = array<i64: 1, 1, 32>}, {transform_indices = @transform_9, window_bounds = array<i64: 1, 1, 32>}, {transform_indices = @transform_10, window_bounds = array<i64: 1, 1, 32>}, {transform_indices = @transform_11, window_bounds = array<i64: 1, 1, 32>}, {transform_indices = @transform_12, window_bounds = array<i64: 1, 1, 32>}, {transform_indices = @transform_13, window_bounds = array<i64: 1, 8, 32>}]} {
    %c0_i32 = arith.constant 0 : i32
    %0 = arith.cmpi eq, %arg1, %c0_i32 : i32
    %1 = arith.extui %0 : i1 to i32
    %c0_i32_0 = arith.constant 0 : i32
    %2 = arith.cmpi ne, %1, %c0_i32_0 : i32
    scf.if %2 {
      %c0_72 = arith.constant 0 : index
      %c0_73 = arith.constant 0 : index
      %c0_74 = arith.constant 0 : index
      %174 = vector.load %arg2[%c0_72, %c0_73, %c0_74] : memref<1x8x32xbf16, #tpu.memory_space<vmem>>, vector<1x8x32xbf16>
      %c0_75 = arith.constant 0 : index
      %c0_76 = arith.constant 0 : index
      %c0_77 = arith.constant 0 : index
      %175 = vector.load %arg15[%c0_75, %c0_76, %c0_77] : memref<1x8x32xbf16, #tpu.memory_space<vmem>>, vector<1x8x32xbf16>
      tpu.vector_store %arg15[%c0_75, %c0_76, %c0_77], %174 {strides = array<i32>} : memref<1x8x32xbf16, #tpu.memory_space<vmem>>, vector<1x8x32xbf16>,
    } else {
    }
    %c0 = arith.constant 0 : index
    %c0_1 = arith.constant 0 : index
    %c0_2 = arith.constant 0 : index
    %3 = vector.load %arg15[%c0, %c0_1, %c0_2] : memref<1x8x32xbf16, #tpu.memory_space<vmem>>, vector<1x8x32xbf16>
    %4 = vector.shape_cast %3 : vector<1x8x32xbf16> to vector<8x32xbf16>
    %5 = arith.extf %4 : vector<8x32xbf16> to vector<8x32xf32>
    %c0_3 = arith.constant 0 : index
    %c0_4 = arith.constant 0 : index
    %c0_5 = arith.constant 0 : index
    %6 = vector.load %arg3[%c0_3, %c0_4, %c0_5] : memref<1x32x96xbf16, #tpu.memory_space<vmem>>, vector<1x32x96xbf16>
    %7 = vector.shape_cast %6 : vector<1x32x96xbf16> to vector<32x96xbf16>
    %cst = arith.constant dense<0.000000e+00> : vector<8x96xf32>
    %8 = tpu.matmul %4, %7, %cst {dimension_numbers = #tpu.dot_dimension_numbers<[1], [0], [0], [1], [0, 0, 1, 1], [], []>} : vector<8x32xbf16>, vector<32x96xbf16>, vector<8x96xf32> -> vector<8x96xf32>
    %c0_6 = arith.constant 0 : index
    %c0_7 = arith.constant 0 : index
    %c0_8 = arith.constant 0 : index
    %9 = vector.load %arg4[%c0_6, %c0_7, %c0_8] : memref<1x1x96xf32, #tpu.memory_space<vmem>>, vector<1x1x96xf32>
    %10 = vector.shape_cast %9 : vector<1x1x96xf32> to vector<1x96xf32>
    %11 = vector.broadcast %10 : vector<1x96xf32> to vector<8x96xf32>
    %12 = arith.addf %8, %11 : vector<8x96xf32>
    %13 = arith.truncf %12 : vector<8x96xf32> to vector<8x96xbf16>
    %14 = vector.extract_strided_slice %13 {offsets = [0, 0], sizes = [8, 8], strides = [1, 1]} : vector<8x96xbf16> to vector<8x8xbf16>
    %15 = vector.shape_cast %14 : vector<8x8xbf16> to vector<1x8x8xbf16>
    %16 = vector.extract_strided_slice %13 {offsets = [0, 32], sizes = [8, 8], strides = [1, 1]} : vector<8x96xbf16> to vector<8x8xbf16>
    %17 = vector.shape_cast %16 : vector<8x8xbf16> to vector<1x8x8xbf16>
    %18 = vector.extract_strided_slice %13 {offsets = [0, 64], sizes = [8, 8], strides = [1, 1]} : vector<8x96xbf16> to vector<8x8xbf16>
    %19 = vector.shape_cast %18 : vector<8x8xbf16> to vector<1x8x8xbf16>
    "tpu.trace_start"() <{level = 10 : i32, message = "bqd,bkd->bqk"}> : () -> ()
    %cst_9 = arith.constant dense<0.000000e+00> : vector<1x8x8xf32>
    %20 = tpu.matmul %15, %17, %cst_9 {dimension_numbers = #tpu.dot_dimension_numbers<[2], [2], [1], [1], [0, 0, 0, 1, 1, 1], [0], [0]>} : vector<1x8x8xbf16>, vector<1x8x8xbf16>, vector<1x8x8xf32> -> vector<1x8x8xf32>
    "tpu.trace_stop"() : () -> ()
    %cst_10 = arith.constant dense<0xFF800000> : vector<1x8xf32>
    %21 = vector.multi_reduction <maximumf>, %20, %cst_10 [2] : vector<1x8x8xf32> to vector<1x8xf32>
    %22 = vector.shape_cast %21 : vector<1x8xf32> to vector<1x8x1xf32>
    %23 = vector.broadcast %22 : vector<1x8x1xf32> to vector<1x8x8xf32>
    %24 = arith.subf %20, %23 : vector<1x8x8xf32>
    %25 = math.exp %24 : vector<1x8x8xf32>
    %cst_11 = arith.constant dense<0.000000e+00> : vector<1x8xf32>
    %26 = vector.multi_reduction <add>, %25, %cst_11 [2] : vector<1x8x8xf32> to vector<1x8xf32>
    %27 = vector.shape_cast %26 : vector<1x8xf32> to vector<1x8x1xf32>
    %28 = tpu.reciprocal %27 {approx = true} : vector<1x8x1xf32> -> vector<1x8x1xf32>
    %29 = vector.broadcast %28 : vector<1x8x1xf32> to vector<1x8x8xf32>
    %30 = arith.mulf %25, %29 : vector<1x8x8xf32>
    %31 = arith.truncf %30 : vector<1x8x8xf32> to vector<1x8x8xbf16>
    "tpu.trace_start"() <{level = 10 : i32, message = "bqk,bkd->bqd"}> : () -> ()
    %cst_12 = arith.constant dense<0.000000e+00> : vector<1x8x8xf32>
    %32 = tpu.matmul %31, %19, %cst_12 {dimension_numbers = #tpu.dot_dimension_numbers<[2], [1], [1], [2], [0, 0, 0, 1, 1, 2], [0], [0]>} : vector<1x8x8xbf16>, vector<1x8x8xbf16>, vector<1x8x8xf32> -> vector<1x8x8xf32>
    "tpu.trace_stop"() : () -> ()
    %33 = vector.shape_cast %32 : vector<1x8x8xf32> to vector<8x8xf32>
    %34 = vector.extract_strided_slice %13 {offsets = [0, 8], sizes = [8, 8], strides = [1, 1]} : vector<8x96xbf16> to vector<8x8xbf16>
    %35 = vector.shape_cast %34 : vector<8x8xbf16> to vector<1x8x8xbf16>
    %36 = vector.extract_strided_slice %13 {offsets = [0, 40], sizes = [8, 8], strides = [1, 1]} : vector<8x96xbf16> to vector<8x8xbf16>
    %37 = vector.shape_cast %36 : vector<8x8xbf16> to vector<1x8x8xbf16>
    %38 = vector.extract_strided_slice %13 {offsets = [0, 72], sizes = [8, 8], strides = [1, 1]} : vector<8x96xbf16> to vector<8x8xbf16>
    %39 = vector.shape_cast %38 : vector<8x8xbf16> to vector<1x8x8xbf16>
    "tpu.trace_start"() <{level = 10 : i32, message = "bqd,bkd->bqk"}> : () -> ()
    %cst_13 = arith.constant dense<0.000000e+00> : vector<1x8x8xf32>
    %40 = tpu.matmul %35, %37, %cst_13 {dimension_numbers = #tpu.dot_dimension_numbers<[2], [2], [1], [1], [0, 0, 0, 1, 1, 1], [0], [0]>} : vector<1x8x8xbf16>, vector<1x8x8xbf16>, vector<1x8x8xf32> -> vector<1x8x8xf32>
    "tpu.trace_stop"() : () -> ()
    %cst_14 = arith.constant dense<0xFF800000> : vector<1x8xf32>
    %41 = vector.multi_reduction <maximumf>, %40, %cst_14 [2] : vector<1x8x8xf32> to vector<1x8xf32>
    %42 = vector.shape_cast %41 : vector<1x8xf32> to vector<1x8x1xf32>
    %43 = vector.broadcast %42 : vector<1x8x1xf32> to vector<1x8x8xf32>
    %44 = arith.subf %40, %43 : vector<1x8x8xf32>
    %45 = math.exp %44 : vector<1x8x8xf32>
    %cst_15 = arith.constant dense<0.000000e+00> : vector<1x8xf32>
    %46 = vector.multi_reduction <add>, %45, %cst_15 [2] : vector<1x8x8xf32> to vector<1x8xf32>
    %47 = vector.shape_cast %46 : vector<1x8xf32> to vector<1x8x1xf32>
    %48 = tpu.reciprocal %47 {approx = true} : vector<1x8x1xf32> -> vector<1x8x1xf32>
    %49 = vector.broadcast %48 : vector<1x8x1xf32> to vector<1x8x8xf32>
    %50 = arith.mulf %45, %49 : vector<1x8x8xf32>
    %51 = arith.truncf %50 : vector<1x8x8xf32> to vector<1x8x8xbf16>
    "tpu.trace_start"() <{level = 10 : i32, message = "bqk,bkd->bqd"}> : () -> ()
    %cst_16 = arith.constant dense<0.000000e+00> : vector<1x8x8xf32>
    %52 = tpu.matmul %51, %39, %cst_16 {dimension_numbers = #tpu.dot_dimension_numbers<[2], [1], [1], [2], [0, 0, 0, 1, 1, 2], [0], [0]>} : vector<1x8x8xbf16>, vector<1x8x8xbf16>, vector<1x8x8xf32> -> vector<1x8x8xf32>
    "tpu.trace_stop"() : () -> ()
    %53 = vector.shape_cast %52 : vector<1x8x8xf32> to vector<8x8xf32>
    %54 = vector.extract_strided_slice %13 {offsets = [0, 16], sizes = [8, 8], strides = [1, 1]} : vector<8x96xbf16> to vector<8x8xbf16>
    %55 = vector.shape_cast %54 : vector<8x8xbf16> to vector<1x8x8xbf16>
    %56 = vector.extract_strided_slice %13 {offsets = [0, 48], sizes = [8, 8], strides = [1, 1]} : vector<8x96xbf16> to vector<8x8xbf16>
    %57 = vector.shape_cast %56 : vector<8x8xbf16> to vector<1x8x8xbf16>
    %58 = vector.extract_strided_slice %13 {offsets = [0, 80], sizes = [8, 8], strides = [1, 1]} : vector<8x96xbf16> to vector<8x8xbf16>
    %59 = vector.shape_cast %58 : vector<8x8xbf16> to vector<1x8x8xbf16>
    "tpu.trace_start"() <{level = 10 : i32, message = "bqd,bkd->bqk"}> : () -> ()
    %cst_17 = arith.constant dense<0.000000e+00> : vector<1x8x8xf32>
    %60 = tpu.matmul %55, %57, %cst_17 {dimension_numbers = #tpu.dot_dimension_numbers<[2], [2], [1], [1], [0, 0, 0, 1, 1, 1], [0], [0]>} : vector<1x8x8xbf16>, vector<1x8x8xbf16>, vector<1x8x8xf32> -> vector<1x8x8xf32>
    "tpu.trace_stop"() : () -> ()
    %cst_18 = arith.constant dense<0xFF800000> : vector<1x8xf32>
    %61 = vector.multi_reduction <maximumf>, %60, %cst_18 [2] : vector<1x8x8xf32> to vector<1x8xf32>
    %62 = vector.shape_cast %61 : vector<1x8xf32> to vector<1x8x1xf32>
    %63 = vector.broadcast %62 : vector<1x8x1xf32> to vector<1x8x8xf32>
    %64 = arith.subf %60, %63 : vector<1x8x8xf32>
    %65 = math.exp %64 : vector<1x8x8xf32>
    %cst_19 = arith.constant dense<0.000000e+00> : vector<1x8xf32>
    %66 = vector.multi_reduction <add>, %65, %cst_19 [2] : vector<1x8x8xf32> to vector<1x8xf32>
    %67 = vector.shape_cast %66 : vector<1x8xf32> to vector<1x8x1xf32>
    %68 = tpu.reciprocal %67 {approx = true} : vector<1x8x1xf32> -> vector<1x8x1xf32>
    %69 = vector.broadcast %68 : vector<1x8x1xf32> to vector<1x8x8xf32>
    %70 = arith.mulf %65, %69 : vector<1x8x8xf32>
    %71 = arith.truncf %70 : vector<1x8x8xf32> to vector<1x8x8xbf16>
    "tpu.trace_start"() <{level = 10 : i32, message = "bqk,bkd->bqd"}> : () -> ()
    %cst_20 = arith.constant dense<0.000000e+00> : vector<1x8x8xf32>
    %72 = tpu.matmul %71, %59, %cst_20 {dimension_numbers = #tpu.dot_dimension_numbers<[2], [1], [1], [2], [0, 0, 0, 1, 1, 2], [0], [0]>} : vector<1x8x8xbf16>, vector<1x8x8xbf16>, vector<1x8x8xf32> -> vector<1x8x8xf32>
    "tpu.trace_stop"() : () -> ()
    %73 = vector.shape_cast %72 : vector<1x8x8xf32> to vector<8x8xf32>
    %74 = vector.extract_strided_slice %13 {offsets = [0, 24], sizes = [8, 8], strides = [1, 1]} : vector<8x96xbf16> to vector<8x8xbf16>
    %75 = vector.shape_cast %74 : vector<8x8xbf16> to vector<1x8x8xbf16>
    %76 = vector.extract_strided_slice %13 {offsets = [0, 56], sizes = [8, 8], strides = [1, 1]} : vector<8x96xbf16> to vector<8x8xbf16>
    %77 = vector.shape_cast %76 : vector<8x8xbf16> to vector<1x8x8xbf16>
    %78 = vector.extract_strided_slice %13 {offsets = [0, 88], sizes = [8, 8], strides = [1, 1]} : vector<8x96xbf16> to vector<8x8xbf16>
    %79 = vector.shape_cast %78 : vector<8x8xbf16> to vector<1x8x8xbf16>
    "tpu.trace_start"() <{level = 10 : i32, message = "bqd,bkd->bqk"}> : () -> ()
    %cst_21 = arith.constant dense<0.000000e+00> : vector<1x8x8xf32>
    %80 = tpu.matmul %75, %77, %cst_21 {dimension_numbers = #tpu.dot_dimension_numbers<[2], [2], [1], [1], [0, 0, 0, 1, 1, 1], [0], [0]>} : vector<1x8x8xbf16>, vector<1x8x8xbf16>, vector<1x8x8xf32> -> vector<1x8x8xf32>
    "tpu.trace_stop"() : () -> ()
    %cst_22 = arith.constant dense<0xFF800000> : vector<1x8xf32>
    %81 = vector.multi_reduction <maximumf>, %80, %cst_22 [2] : vector<1x8x8xf32> to vector<1x8xf32>
    %82 = vector.shape_cast %81 : vector<1x8xf32> to vector<1x8x1xf32>
    %83 = vector.broadcast %82 : vector<1x8x1xf32> to vector<1x8x8xf32>
    %84 = arith.subf %80, %83 : vector<1x8x8xf32>
    %85 = math.exp %84 : vector<1x8x8xf32>
    %cst_23 = arith.constant dense<0.000000e+00> : vector<1x8xf32>
    %86 = vector.multi_reduction <add>, %85, %cst_23 [2] : vector<1x8x8xf32> to vector<1x8xf32>
    %87 = vector.shape_cast %86 : vector<1x8xf32> to vector<1x8x1xf32>
    %88 = tpu.reciprocal %87 {approx = true} : vector<1x8x1xf32> -> vector<1x8x1xf32>
    %89 = vector.broadcast %88 : vector<1x8x1xf32> to vector<1x8x8xf32>
    %90 = arith.mulf %85, %89 : vector<1x8x8xf32>
    %91 = arith.truncf %90 : vector<1x8x8xf32> to vector<1x8x8xbf16>
    "tpu.trace_start"() <{level = 10 : i32, message = "bqk,bkd->bqd"}> : () -> ()
    %cst_24 = arith.constant dense<0.000000e+00> : vector<1x8x8xf32>
    %92 = tpu.matmul %91, %79, %cst_24 {dimension_numbers = #tpu.dot_dimension_numbers<[2], [1], [1], [2], [0, 0, 0, 1, 1, 2], [0], [0]>} : vector<1x8x8xbf16>, vector<1x8x8xbf16>, vector<1x8x8xf32> -> vector<1x8x8xf32>
    "tpu.trace_stop"() : () -> ()
    %93 = vector.shape_cast %92 : vector<1x8x8xf32> to vector<8x8xf32>
    %94 = tpu.concatenate %33, %53, %73, %93 in 1 : vector<8x8xf32>, vector<8x8xf32>, vector<8x8xf32>, vector<8x8xf32> -> vector<8x32xf32>
    %95 = arith.truncf %94 : vector<8x32xf32> to vector<8x32xbf16>
    %c0_25 = arith.constant 0 : index
    %c0_26 = arith.constant 0 : index
    %c0_27 = arith.constant 0 : index
    %96 = vector.load %arg5[%c0_25, %c0_26, %c0_27] : memref<1x32x32xbf16, #tpu.memory_space<vmem>>, vector<1x32x32xbf16>
    %97 = vector.shape_cast %96 : vector<1x32x32xbf16> to vector<32x32xbf16>
    %cst_28 = arith.constant dense<0.000000e+00> : vector<8x32xf32>
    %98 = tpu.matmul %95, %97, %cst_28 {dimension_numbers = #tpu.dot_dimension_numbers<[1], [0], [0], [1], [0, 0, 1, 1], [], []>} : vector<8x32xbf16>, vector<32x32xbf16>, vector<8x32xf32> -> vector<8x32xf32>
    %c0_29 = arith.constant 0 : index
    %c0_30 = arith.constant 0 : index
    %c0_31 = arith.constant 0 : index
    %99 = vector.load %arg6[%c0_29, %c0_30, %c0_31] : memref<1x1x32xf32, #tpu.memory_space<vmem>>, vector<1x1x32xf32>
    %100 = vector.shape_cast %99 : vector<1x1x32xf32> to vector<1x32xf32>
    %101 = vector.broadcast %100 : vector<1x32xf32> to vector<8x32xf32>
    %102 = arith.addf %98, %101 : vector<8x32xf32>
    %103 = arith.addf %5, %102 : vector<8x32xf32>
    %c0_32 = arith.constant 0 : index
    %c0_33 = arith.constant 0 : index
    %c0_34 = arith.constant 0 : index
    %104 = vector.load %arg11[%c0_32, %c0_33, %c0_34] : memref<1x1x32xf32, #tpu.memory_space<vmem>>, vector<1x1x32xf32>
    %105 = vector.shape_cast %104 : vector<1x1x32xf32> to vector<1x32xf32>
    %c0_35 = arith.constant 0 : index
    %c0_36 = arith.constant 0 : index
    %c0_37 = arith.constant 0 : index
    %106 = vector.load %arg12[%c0_35, %c0_36, %c0_37] : memref<1x1x32xf32, #tpu.memory_space<vmem>>, vector<1x1x32xf32>
    %107 = vector.shape_cast %106 : vector<1x1x32xf32> to vector<1x32xf32>
    %cst_38 = arith.constant dense<0.000000e+00> : vector<8xf32>
    %108 = vector.multi_reduction <add>, %103, %cst_38 [1] : vector<8x32xf32> to vector<8xf32>
    %109 = vector.shape_cast %108 : vector<8xf32> to vector<8x1xf32>
    %cst_39 = arith.constant 3.200000e+01 : f32
    %110 = vector.broadcast %cst_39 : f32 to vector<8x1xf32>
    %111 = arith.divf %109, %110 : vector<8x1xf32>
    %112 = vector.broadcast %111 : vector<8x1xf32> to vector<8x32xf32>
    %113 = arith.subf %103, %112 : vector<8x32xf32>
    %114 = arith.mulf %113, %113 : vector<8x32xf32>
    %cst_40 = arith.constant dense<0.000000e+00> : vector<8xf32>
    %115 = vector.multi_reduction <add>, %114, %cst_40 [1] : vector<8x32xf32> to vector<8xf32>
    %116 = vector.shape_cast %115 : vector<8xf32> to vector<8x1xf32>
    %cst_41 = arith.constant 3.200000e+01 : f32
    %117 = vector.broadcast %cst_41 : f32 to vector<8x1xf32>
    %118 = arith.divf %116, %117 : vector<8x1xf32>
    %cst_42 = arith.constant 9.99999974E-6 : f32
    %119 = vector.broadcast %cst_42 : f32 to vector<8x1xf32>
    %120 = arith.addf %118, %119 : vector<8x1xf32>
    %121 = math.rsqrt %120 : vector<8x1xf32>
    %122 = vector.broadcast %121 : vector<8x1xf32> to vector<8x32xf32>
    %123 = arith.mulf %113, %122 : vector<8x32xf32>
    %124 = vector.broadcast %105 : vector<1x32xf32> to vector<8x32xf32>
    %125 = arith.mulf %123, %124 : vector<8x32xf32>
    %126 = vector.broadcast %107 : vector<1x32xf32> to vector<8x32xf32>
    %127 = arith.addf %125, %126 : vector<8x32xf32>
    %128 = arith.truncf %127 : vector<8x32xf32> to vector<8x32xbf16>
    %c0_43 = arith.constant 0 : index
    %c0_44 = arith.constant 0 : index
    %c0_45 = arith.constant 0 : index
    %129 = vector.load %arg7[%c0_43, %c0_44, %c0_45] : memref<1x32x64xbf16, #tpu.memory_space<vmem>>, vector<1x32x64xbf16>
    %130 = vector.shape_cast %129 : vector<1x32x64xbf16> to vector<32x64xbf16>
    %cst_46 = arith.constant dense<0.000000e+00> : vector<8x64xf32>
    %131 = tpu.matmul %128, %130, %cst_46 {dimension_numbers = #tpu.dot_dimension_numbers<[1], [0], [0], [1], [0, 0, 1, 1], [], []>} : vector<8x32xbf16>, vector<32x64xbf16>, vector<8x64xf32> -> vector<8x64xf32>
    %c0_47 = arith.constant 0 : index
    %c0_48 = arith.constant 0 : index
    %c0_49 = arith.constant 0 : index
    %132 = vector.load %arg8[%c0_47, %c0_48, %c0_49] : memref<1x1x64xf32, #tpu.memory_space<vmem>>, vector<1x1x64xf32>
    %133 = vector.shape_cast %132 : vector<1x1x64xf32> to vector<1x64xf32>
    %134 = vector.broadcast %133 : vector<1x64xf32> to vector<8x64xf32>
    %135 = arith.addf %131, %134 : vector<8x64xf32>
    %cst_50 = arith.constant 0.000000e+00 : f32
    %136 = vector.broadcast %cst_50 : f32 to vector<8x64xf32>
    %137 = arith.maximumf %135, %136 : vector<8x64xf32>
    %138 = arith.truncf %137 : vector<8x64xf32> to vector<8x64xbf16>
    %c0_51 = arith.constant 0 : index
    %c0_52 = arith.constant 0 : index
    %c0_53 = arith.constant 0 : index
    %139 = vector.load %arg9[%c0_51, %c0_52, %c0_53] : memref<1x64x32xbf16, #tpu.memory_space<vmem>>, vector<1x64x32xbf16>
    %140 = vector.shape_cast %139 : vector<1x64x32xbf16> to vector<64x32xbf16>
    %cst_54 = arith.constant dense<0.000000e+00> : vector<8x32xf32>
    %141 = tpu.matmul %138, %140, %cst_54 {dimension_numbers = #tpu.dot_dimension_numbers<[1], [0], [0], [1], [0, 0, 1, 1], [], []>} : vector<8x64xbf16>, vector<64x32xbf16>, vector<8x32xf32> -> vector<8x32xf32>
    %c0_55 = arith.constant 0 : index
    %c0_56 = arith.constant 0 : index
    %c0_57 = arith.constant 0 : index
    %142 = vector.load %arg10[%c0_55, %c0_56, %c0_57] : memref<1x1x32xf32, #tpu.memory_space<vmem>>, vector<1x1x32xf32>
    %143 = vector.shape_cast %142 : vector<1x1x32xf32> to vector<1x32xf32>
    %144 = vector.broadcast %143 : vector<1x32xf32> to vector<8x32xf32>
    %145 = arith.addf %141, %144 : vector<8x32xf32>
    %146 = arith.addf %127, %145 : vector<8x32xf32>
    %c0_58 = arith.constant 0 : index
    %c0_59 = arith.constant 0 : index
    %c0_60 = arith.constant 0 : index
    %147 = vector.load %arg13[%c0_58, %c0_59, %c0_60] : memref<1x1x32xf32, #tpu.memory_space<vmem>>, vector<1x1x32xf32>
    %148 = vector.shape_cast %147 : vector<1x1x32xf32> to vector<1x32xf32>
    %c0_61 = arith.constant 0 : index
    %c0_62 = arith.constant 0 : index
    %c0_63 = arith.constant 0 : index
    %149 = vector.load %arg14[%c0_61, %c0_62, %c0_63] : memref<1x1x32xf32, #tpu.memory_space<vmem>>, vector<1x1x32xf32>
    %150 = vector.shape_cast %149 : vector<1x1x32xf32> to vector<1x32xf32>
    %cst_64 = arith.constant dense<0.000000e+00> : vector<8xf32>
    %151 = vector.multi_reduction <add>, %146, %cst_64 [1] : vector<8x32xf32> to vector<8xf32>
    %152 = vector.shape_cast %151 : vector<8xf32> to vector<8x1xf32>
    %cst_65 = arith.constant 3.200000e+01 : f32
    %153 = vector.broadcast %cst_65 : f32 to vector<8x1xf32>
    %154 = arith.divf %152, %153 : vector<8x1xf32>
    %155 = vector.broadcast %154 : vector<8x1xf32> to vector<8x32xf32>
    %156 = arith.subf %146, %155 : vector<8x32xf32>
    %157 = arith.mulf %156, %156 : vector<8x32xf32>
    %cst_66 = arith.constant dense<0.000000e+00> : vector<8xf32>
    %158 = vector.multi_reduction <add>, %157, %cst_66 [1] : vector<8x32xf32> to vector<8xf32>
    %159 = vector.shape_cast %158 : vector<8xf32> to vector<8x1xf32>
    %cst_67 = arith.constant 3.200000e+01 : f32
    %160 = vector.broadcast %cst_67 : f32 to vector<8x1xf32>
    %161 = arith.divf %159, %160 : vector<8x1xf32>
    %cst_68 = arith.constant 9.99999974E-6 : f32
    %162 = vector.broadcast %cst_68 : f32 to vector<8x1xf32>
    %163 = arith.addf %161, %162 : vector<8x1xf32>
    %164 = math.rsqrt %163 : vector<8x1xf32>
    %165 = vector.broadcast %164 : vector<8x1xf32> to vector<8x32xf32>
    %166 = arith.mulf %156, %165 : vector<8x32xf32>
    %167 = vector.broadcast %148 : vector<1x32xf32> to vector<8x32xf32>
    %168 = arith.mulf %166, %167 : vector<8x32xf32>
    %169 = vector.broadcast %150 : vector<1x32xf32> to vector<8x32xf32>
    %170 = arith.addf %168, %169 : vector<8x32xf32>
    %171 = vector.shape_cast %170 : vector<8x32xf32> to vector<1x8x32xf32>
    %172 = arith.truncf %171 : vector<1x8x32xf32> to vector<1x8x32xbf16>
    %c0_69 = arith.constant 0 : index
    %c0_70 = arith.constant 0 : index
    %c0_71 = arith.constant 0 : index
    %173 = vector.load %arg15[%c0_69, %c0_70, %c0_71] : memref<1x8x32xbf16, #tpu.memory_space<vmem>>, vector<1x8x32xbf16>
    tpu.vector_store %arg15[%c0_69, %c0_70, %c0_71], %172 {strides = array<i32>} : memref<1x8x32xbf16, #tpu.memory_space<vmem>>, vector<1x8x32xbf16>,
    return
  }
  func.func @transform_0(%arg0: i32, %arg1: i32) -> (i32, i32, i32) {
    %c0_i32 = arith.constant 0 : i32
    %c0_i32_0 = arith.constant 0 : i32
    %c0_i32_1 = arith.constant 0 : i32
    return %arg0, %c0_i32, %c0_i32_0 : i32, i32, i32
  }
  func.func @transform_1(%arg0: i32, %arg1: i32) -> (i32, i32, i32) {
    %c0_i32 = arith.constant 0 : i32
    %c0_i32_0 = arith.constant 0 : i32
    %c0_i32_1 = arith.constant 0 : i32
    return %arg1, %c0_i32, %c0_i32_0 : i32, i32, i32
  }
  func.func @transform_2(%arg0: i32, %arg1: i32) -> (i32, i32, i32) {
    %c0_i32 = arith.constant 0 : i32
    %c0_i32_0 = arith.constant 0 : i32
    %c0_i32_1 = arith.constant 0 : i32
    return %arg1, %c0_i32, %c0_i32_0 : i32, i32, i32
  }
  func.func @transform_3(%arg0: i32, %arg1: i32) -> (i32, i32, i32) {
    %c0_i32 = arith.constant 0 : i32
    %c0_i32_0 = arith.constant 0 : i32
    %c0_i32_1 = arith.constant 0 : i32
    return %arg1, %c0_i32, %c0_i32_0 : i32, i32, i32
  }
  func.func @transform_4(%arg0: i32, %arg1: i32) -> (i32, i32, i32) {
    %c0_i32 = arith.constant 0 : i32
    %c0_i32_0 = arith.constant 0 : i32
    %c0_i32_1 = arith.constant 0 : i32
    return %arg1, %c0_i32, %c0_i32_0 : i32, i32, i32
  }
  func.func @transform_5(%arg0: i32, %arg1: i32) -> (i32, i32, i32) {
    %c0_i32 = arith.constant 0 : i32
    %c0_i32_0 = arith.constant 0 : i32
    %c0_i32_1 = arith.constant 0 : i32
    return %arg1, %c0_i32, %c0_i32_0 : i32, i32, i32
  }
  func.func @transform_6(%arg0: i32, %arg1: i32) -> (i32, i32, i32) {
    %c0_i32 = arith.constant 0 : i32
    %c0_i32_0 = arith.constant 0 : i32
    %c0_i32_1 = arith.constant 0 : i32
    return %arg1, %c0_i32, %c0_i32_0 : i32, i32, i32
  }
  func.func @transform_7(%arg0: i32, %arg1: i32) -> (i32, i32, i32) {
    %c0_i32 = arith.constant 0 : i32
    %c0_i32_0 = arith.constant 0 : i32
    %c0_i32_1 = arith.constant 0 : i32
    return %arg1, %c0_i32, %c0_i32_0 : i32, i32, i32
  }
  func.func @transform_8(%arg0: i32, %arg1: i32) -> (i32, i32, i32) {
    %c0_i32 = arith.constant 0 : i32
    %c0_i32_0 = arith.constant 0 : i32
    %c0_i32_1 = arith.constant 0 : i32
    return %arg1, %c0_i32, %c0_i32_0 : i32, i32, i32
  }
  func.func @transform_9(%arg0: i32, %arg1: i32) -> (i32, i32, i32) {
    %c0_i32 = arith.constant 0 : i32
    %c0_i32_0 = arith.constant 0 : i32
    %c0_i32_1 = arith.constant 0 : i32
    return %arg1, %c0_i32, %c0_i32_0 : i32, i32, i32
  }
  func.func @transform_10(%arg0: i32, %arg1: i32) -> (i32, i32, i32) {
    %c0_i32 = arith.constant 0 : i32
    %c0_i32_0 = arith.constant 0 : i32
    %c0_i32_1 = arith.constant 0 : i32
    return %arg1, %c0_i32, %c0_i32_0 : i32, i32, i32
  }
  func.func @transform_11(%arg0: i32, %arg1: i32) -> (i32, i32, i32) {
    %c0_i32 = arith.constant 0 : i32
    %c0_i32_0 = arith.constant 0 : i32
    %c0_i32_1 = arith.constant 0 : i32
    return %arg1, %c0_i32, %c0_i32_0 : i32, i32, i32
  }
  func.func @transform_12(%arg0: i32, %arg1: i32) -> (i32, i32, i32) {
    %c0_i32 = arith.constant 0 : i32
    %c0_i32_0 = arith.constant 0 : i32
    %c0_i32_1 = arith.constant 0 : i32
    return %arg1, %c0_i32, %c0_i32_0 : i32, i32, i32
  }
  func.func @transform_13(%arg0: i32, %arg1: i32) -> (i32, i32, i32) {
    %c0_i32 = arith.constant 0 : i32
    %c0_i32_0 = arith.constant 0 : i32
    %c0_i32_1 = arith.constant 0 : i32
    return %arg0, %c0_i32, %c0_i32_0 : i32, i32, i32
  }
}

</mosaic_0001>

<bundles_post_ra>
// kernel: tpu_custom_call.1
= control target key start
LH: loop header
LB: loop body
LE: loop exit
PB: predicated region body
PF: predicated region fallthrough
CT: control target
= control target key end

     0   :  { %s2557_s0 = inlined_call_operand.hbm [shape: bf16[2,8,32], index: 0, kind: input, shape index: {}]   ;;  %s2558_s1 = inlined_call_operand.vmem [shape: bf16[2,32,96], index: 1, kind: input, shape index: {}]   ;;  %s2559_s2 = inlined_call_operand.vmem [shape: f32[2,1,96], index: 2, kind: input, shape index: {}]   ;;  %s2560_s3 = inlined_call_operand.vmem [shape: bf16[2,32,32], index: 3, kind: input, shape index: {}]   ;;  %s2561_s4 = inlined_call_operand.vmem [shape: f32[2,1,32], index: 4, kind: input, shape index: {}]   ;;  %s2562_s5 = inlined_call_operand.vmem [shape: bf16[2,32,64], index: 5, kind: input, shape index: {}]   ;;  %s2563_s6 = inlined_call_operand.vmem [shape: f32[2,1,64], index: 6, kind: input, shape index: {}]   ;;  %s2564_s7 = inlined_call_operand.vmem [shape: bf16[2,64,32], index: 7, kind: input, shape index: {}]   ;;  %s2565_s8 = inlined_call_operand.vmem [shape: f32[2,1,32], index: 8, kind: input, shape index: {}]   ;;  %s2566_s9 = inlined_call_operand.vmem [shape: f32[2,1,32], index: 9, kind: input, shape index: {}]   ;;  %s2567_s10 = inlined_call_operand.vmem [shape: f32[2,1,32], index: 10, kind: input, shape index: {}]   ;;  %s2568_s11 = inlined_call_operand.vmem [shape: f32[2,1,32], index: 11, kind: input, shape index: {}]   ;;  %s2569_s12 = inlined_call_operand.vmem [shape: f32[2,1,32], index: 12, kind: input, shape index: {}]   ;;  %s2570_s13 = inlined_call_operand.hbm [shape: bf16[2,8,32], index: 13, kind: output, shape index: {}]  }
   0x1   :  { %2584 = sst [smem:[#allocation21_spill]] %s2557_s0 }
   0x2   :  { %2585 = sst [smem:[#allocation22_spill]] %s2558_s1 }
   0x3   :  { %2586 = sst [smem:[#allocation23_spill]] %s2560_s3 }
   0x4   :  { %2587 = sst [smem:[#allocation24_spill]] %s2562_s5 }
   0x5   :  { %2588 = sst [smem:[#allocation25_spill]] %s2563_s6 }
   0x6   :  { %2589 = sst [smem:[#allocation26_spill]] %s2564_s7 }
   0x7   :  { %2590 = sst [smem:[#allocation27_spill]] %s2567_s10 }
   0x8   :  { %2591 = sst [smem:[#allocation28_spill]] %s2568_s11 }
   0x9   :  { %2592 = sst [smem:[#allocation29_spill]] %s2569_s12 }
   0xa   :  { %2593 = sst [smem:[#allocation30_spill]] %s2570_s13 }
   0xb   :  { %18 = vsyncpa [#allocation3], 0 }
   0xc   :  { %20 = vsyncpa [#allocation3 + $0x1], 0 }
   0xd   :  { %21 = vsyncpa [#allocation4], 0 }
   0xe   :  { %23 = vsyncpa [#allocation4 + $0x1], 0  ;;  %s2202_s25 = smov 0   ;;  %s2204_s26 = smov 0  }
   0xf   :  { %s2206_s27 = smov 0   ;;  %s2208_s28 = smov 0  }
  0x10   :  { %s2210_s29 = smov 0   ;;  %s2212_s30 = smov 0  }
  0x11   :  { %s2214_s14 = smov 0   ;;  %s2216_s15 = smov 0  }
  0x12 LB: > { %2594 = sst [smem:[#allocation8_spill]] %s2084_s25  ;;  %s1694_s16 = sadd.s32 4294967295, %s2112_s15   ;;  %s2112_s15 = sphi %s2216_s15, %s29_s15   ;;  %s2108_s14 = sphi %s2214_s14, %s2642_s14   ;;  %s2104_s30 = sphi %s2212_s30, %s2641_s30   ;;  %s2100_s29 = sphi %s2210_s29, %s2640_s29   ;;  %s2096_s28 = sphi %s2208_s28, %s2639_s28   ;;  %s2092_s27 = sphi %s2206_s27, %s2638_s27   ;;  %s2088_s26 = sphi %s2204_s26, %s2637_s26   ;;  %s2084_s25 = sphi %s2202_s25, %s2636_s25  }
  0x13   : > { %2595 = sst [smem:[#allocation9_spill]] %s2088_s26  ;;  %s1695_s17 = sadd.s32 4294967294, %s2112_s15  }
  0x14   : > { %2596 = sst [smem:[#allocation10_spill]] %s2092_s27  ;;  %s38_s18 = sadd.s32 1, %s2104_s30 }
  0x15   : > { %2597 = sst [smem:[#allocation11_spill]] %s2100_s29  ;;  %s41_s19 = sadd.s32 1, %s2108_s14 }
  0x16   : > { %2598 = sst [smem:[#allocation12_spill]] %s2104_s30  ;;  %p39_p0 = scmp.ge.s32.totalorder %s38_s18, 2 }
  0x17   : > { %2599 = sst [smem:[#allocation13_spill]] %s2108_s14  ;;  %s48_s20 = sadd.s32 1, %s2092_s27 }
  0x18   : > { %2600 = sst [smem:[#allocation14_spill]] %s2112_s15  ;;  %p55_p1 = scmp.ne.s32.totalorder %s2092_s27, %s2088_s26 }
  0x19   : > { %p56_p2 = scmp.eq.s32.totalorder %s2112_s15, 0  ;;  %s2644_s18 = smov (%p39_p0, %s38_s18), 0 }
  0x1a   : > { %2601 = sst [smem:[#allocation15_spill]] %s2644_s18  ;;  %s2646_s19 = smov (!%p39_p0, %s41_s19), %s2108_s14 }
  0x1b   : > { %p2253_p3 = por %p56_p2, %p55_p1  ;;  %p61_p4 = scmp.ne.s32.totalorder %s2088_s26, %s2084_s25 }
  0x1c   : > { %p43_p5 = scmp.ge.s32.totalorder %s2646_s19, 2  ;;  %p62_p6 = scmp.eq.s32.totalorder %s1694_s16, 0 }
  0x1d   : > { %p397_p7 = scmp.eq.s32.totalorder %s1694_s16, 3  ;;  %p403_p8 = scmp.eq.s32.totalorder %s1695_s17, 3 }
  0x1e   : > { %s2648_s19 = smov (%p43_p5, %s2646_s19), 0  ;;  %p2261_p9 = por %p62_p6, %p61_p4 }
  0x1f   : > { %2603 = sst [smem:[#allocation16_spill]] %s2648_s19  ;;  %p2265_p10 = por %p397_p7, %p55_p1 }
  0x20   : > { %s45_s24 = ssub.s32 %s2108_s14, %s2648_s19  ;;  %p2271_p11 = por %p403_p8, %p61_p4 }
  0x21   : > { %s2605_s23 = scalar_select %p2265_p10, 1, 0 }
  0x22   : > { %s2607_s18 = scalar_select %p2271_p11, 1, 0 }
  0x23   : > { %2606 = sst [smem:[#allocation17_spill]] %s2605_s23  ;;  %p46_p12 = scmp.eq.s32.totalorder %s45_s24, 0 }
  0x24   : > { %2608 = sst [smem:[#allocation18_spill]] %s2607_s18  ;;  %p1876_p13 = scmp.lt.s32.totalorder %s2112_s15, 4 }
  0x25   : > { %s423_s16 = sand.u32 1, %s2092_s27   ;;  %s1699_s25 = sshll.u32 %s2108_s14, 6 }
  0x26   : > { %s2278_s17 = scalar_select %p46_p12, %s2092_s27, %s48_s20  }
  0x27   : > { %s1698_s30 = sshll.u32 %s423_s16, 2  ;;  %s2610_s0 = sld [smem:[#allocation21_spill]] }
  0x28   : > { %2609 = sst [smem:[#allocation19_spill]] %s2278_s17  ;;  %s427_s11 = scalar_lea.vmem [#allocation2], %s1698_s30 }
  0x29   : > { %s434_s10 = sshll.u32 %s427_s11, 4  ;;  %p2286_p0 = pnand %p1876_p13, %p2253_p3  ;;  %s435_s10 = int_to_ptr.vmem [resolvable:$true] %s434_s10 }
  0x2a   : > { %p1700_p1 = scmp.ge.s32.totalorder %s2112_s15, 1  ;;  %p519_p2 = scmp.lt.s32.totalorder %s2112_s15, 5 }
  0x2b   : > { %s424_s24 = scalar_lea.sflag [#allocation3], %s423_s16  ;;  %p1990_p4 = pneg %p2286_p0 }
  0x2c   : > { %s2001_s20 = scalar_lea.vmem %s435_s10, 64  ;;  %s2114_s13 = smov [#allocation2]  }
  0x2d   : > { %s432_s12 = scalar_lea.hbm %s2610_s0, %s1699_s25  ;;  %p2002_p5 = scmp.ne.s32.totalorder %s435_s10, %s2001_s20 }
  0x2e   : > { %s2006_s25 = sshll.u32 %s2114_s13, 4  ;;  %s2007_s25 = int_to_ptr.vmem [resolvable:$false] %s2006_s25 }
  0x2f   : > { %p2004_p6 = pnand %p2002_p5, %p1990_p4  ;;  %s2008_s11 = scalar_lea.vmem %s2007_s25, 128 }
  0x30   : > { %p2009_p8 = scmp.lt.s32.totalorder %s435_s10, %s2007_s25  ;;  %p2010_p12 = scmp.lt.s32.totalorder %s2008_s11, %s2001_s20 }
  0x31   : > { %p2005_p7 = pneg %p2004_p6 }
  0x32   : > { %p2011_p3 = por %p2010_p12, %p2009_p8 }
  0x34   : > { %p2012_p13 = pnand %p2011_p3, %p2005_p7 }
  0x36   : > { %2015 = shalt.err (!%p2012_p13)
}
  0x37   : > { %1871 = dma.hbm_to_vmem [thread:$0]  (!%p2286_p0), %s432_s12, 64, %s435_s10, %s424_s24  }
  0x38   : > { %p520_p11 = pnand %p1700_p1, %p519_p2 }
  0x3a   : > { %523 = sbr.rel (%p520_p11) target bundleno = 2521 (0x9d9), region = 72 }
  0x3f   : > { %s2301_s29 = sand.u32 1, %s2088_s26  }
  0x40   : > { %2612 = sst [smem:[#allocation20_spill]] %s2301_s29  ;;  %s1701_s30 = sshll.u32 %s2301_s29, 2 }
  0x41   : > { %s526_s21 = scalar_lea.sflag [#allocation3], %s2301_s29  ;;  %s529_s16 = scalar_lea.vmem [#allocation2], %s1701_s30 }
  0x42   : > { %2075 = dma.done.wait (%p2261_p9), %s526_s21, 64  }
  0x43   : > { %2077 = vsyncadd (%p2261_p9), %s526_s21, 4294967232  ;;  %p616_p0 = scmp.lt.s32.totalorder %s2096_s28, 1  ;;  %s2613_s1 = sld [smem:[#allocation22_spill]] }
  0x44   : > { %s2614_s3 = sld [smem:[#allocation23_spill]]  ;;  %p1711_p9 = scmp.ne.s32.totalorder %s2096_s28, 0 }
  0x45   : > { %s2311_s10 = scalar_select %p616_p0, %s2096_s28, 1 }
  0x46   : > { %s2615_s5 = sld [smem:[#allocation24_spill]] }
  0x47   : > { %s1746_s12 = sshll.u32 %s2311_s10, 4  ;;  %s1749_s20 = sshll.u32 %s2311_s10, 5 }
  0x48   : > { %s2617_s7 = sld [smem:[#allocation26_spill]]  ;;  %s647_s14 = scalar_lea.vmem %s2565_s8, %s2311_s10 }
  0x49   : > { %s620_s25 = scalar_lea.vmem %s2613_s1, %s1746_s12  ;;  %s650_s26 = scalar_lea.vmem %s2566_s9, %s2311_s10 }
  0x4a   : > { %s2324_s0 = scalar_lea.vmem %s2614_s3, %s1746_s12  ;;  %s2619_s22 = sld [smem:[#allocation28_spill]] }
  0x4c   : > { %s2333_s15 = scalar_lea.vmem %s2615_s5, %s1746_s12  ;;  %s2618_s5 = sld [smem:[#allocation27_spill]] }
  0x4e   : > { %s2343_s11 = scalar_lea.vmem %s2617_s7, %s1749_s20  ;;  %s2620_s20 = sld [smem:[#allocation29_spill]] }
  0x4f   : > { %s2365_s7 = scalar_lea.vmem [#allocation5], %s1701_s30 }
  0x50   : > { %s656_s29 = scalar_lea.vmem %s2619_s22, %s2311_s10  ;;  %664 = sbr.rel (%p1711_p9) target bundleno = 87 (0x57), region = 80 }
  0x52   : > { %s653_s23 = scalar_lea.vmem %s2618_s5, %s2311_s10 }
  0x54   : > { %s659_s13 = scalar_lea.vmem %s2620_s20, %s2311_s10 }
  0x55   : > { %v665_v0 = vld [vmem:[%s529_s16] sm:$0xf]  ;;  %vm666_vm0 = vcmask 257024  }
  0x56   : > { %667 = vst.msk [vmem:[%s2365_s7] sm:$0xf] %vm666_vm0, %v665_v0 }
  0x57 PF: > { %v1958_v1 = vld [vmem:[%s620_s25 + $0x8] sm:$0xff]   ;;  %v2115_v2 = vmov 0.0   ;;  %v1959_v3 = vld [vmem:[%s620_s25] sm:$0xff]   ;;  %vm2116_vm1 = vmmov 0   ;;  %vm693_vm2 = vcmask 261120   ;;  %s2621_s6 = scalar_lea.vmem %s2559_s2, %s2311_s10  ;;  %s2117_s27 = smov 120  }
  0x58   : > { %1780 = vmatprep.subr.bf16.mxu0 %v2115_v2  ;;  %1788 = vmatprep.subr.bf16.mxu1 %v2115_v2  ;;  %v1712_v5 = vld [vmem:[%s2621_s6] ss:$0 sm:$0xff]  ;;  %s2118_s28 = smov 96   ;;  %s2119_s30 = smov 80   ;;  %vm741_vm3 = vcmask 64512   ;;  %vm805_vm4 = vcmask 1043456  }
  0x59   : > { %1781 = vmatpush3.bf16.msra.mxu0 %v1958_v1  ;;  %1784 = vmatprep.mubr.msk.bf16.mxu0 %vm2116_vm1, %v2115_v2  ;;  %s2120_s16 = smov 88   ;;  %s2121_s22 = smov 72   ;;  %vm1192_vm5 = vcmask 130048   ;;  %vm1194_vm6 = vcmask 195584   ;;  %vm1402_vm7 = vcmask 523264   ;;  %vm1477_vm8 = vcmask 257024  }
  0x5a   : > { %1782 = vmatprep.subr.bf16.mxu0 %v2115_v2  ;;  %1790 = vmatprep.mubr.msk.bf16.mxu1 %vm2116_vm1, %v2115_v2  ;;  %s2122_s25 = smov 112   ;;  %s2123_s21 = smov 104  }
  0x5b   : > { %s2124_s17 = smov 56   ;;  %s2125_s18 = smov 64  }
  0x5c   : > { %s2126_s12 = smov 40   ;;  %s2127_s19 = smov 48  }
  0x5d   : > { %v2377_v4 = vld [vmem:[%s2365_s7] sm:$0xf]  ;;  %1783 = vmatpush3.bf16.msra.mxu0 %v1959_v3  ;;  %s2128_s24 = smov 8   ;;  %s2129_s1 = smov 16  }
  0x5e   : > { %1794 = vmatprep.subr.bf16.mxu0 %v2115_v2  ;;  %s2130_s20 = smov 24   ;;  %s2622_s5 = scalar_lea.vmem %s2561_s4, %s2311_s10 }
  0x5f   : > { %s1493_s3 = sshll.u32 %s2365_s7, 4  ;;  %s2631_s6 = sld [smem:[#allocation30_spill]]  ;;  %s1494_s3 = int_to_ptr.vmem [resolvable:$true] %s1493_s3 }
  0x60   : > { %1785 = vmatmul.mubr.msk.bf16.vlgmr.msra.gmra.mxu0 %vm693_vm2, %v2377_v4 }
  0x61   : > { %1796 = vmatprep.mubr.msk.bf16.mxu0 %vm2116_vm1, %v2115_v2 }
 0x120   : > { %v731_v6 = vpop.f32.mrf.mxu0 }
 0x121   : > { %v732_v7 = vadd.f32 %v1712_v5, %v731_v6 }
 0x122   : > { %v1786_v8 = vpop.f32.mrf.mxu0 }
 0x123   : > { %v2389_v9 = vpack.c.bf16 %v732_v7, %v732_v7 }
 0x124   : > { %v734_v10 = vpop.f32.mrf.mxu0 }
 0x125   : > { %849 = vrot.lane.b32.xlu1 %v2389_v9, %s2117_s27  ;;  %739 = vrot.lane.b32.xlu0 %v2389_v9, %s2118_s28 }
 0x126   : > { %v1787_v11 = vpop.f32.mrf.mxu0 }
 0x129   : > { %961 = vrot.lane.b32.xlu1 %v2389_v9, %s2119_s30  ;;  %851 = vrot.lane.b32.xlu0 %v2389_v9, %s2120_s16 }
 0x12d   : > { %1071 = vrot.lane.b32.xlu1 %v2389_v9, %s2121_s22  ;;  %959 = vrot.lane.b32.xlu0 %v2389_v9, %s2122_s25  ;;  %s2624_s22 = sld [smem:[#allocation25_spill]] }
 0x131   : > { %1069 = vrot.lane.b32.xlu0 %v2389_v9, %s2123_s21 }
 0x133   : > { %s2625_s25 = scalar_lea.vmem %s2624_s22, %s2311_s10  ;;  %s2131_s10 = smov [#allocation5]  }
 0x197   : > { %v740_v12 = vpop.permute.xlu0 %739  ;;  %v850_v15 = vpop.permute.xlu1 %849 }
 0x198   : > { %v746_v13 = vsel %vm741_vm3, %v740_v12, 0 }
 0x199   : > { %1789 = vmatpush3.bf16.xpose.msra.mxu1 %v746_v13 }
 0x19a   : > { %1800 = vmatprep.subr.bf16.mxu1 %v2115_v2 }
 0x19b   : > { %v852_v14 = vpop.permute.xlu0 %851  ;;  %v962_v17 = vpop.permute.xlu1 %961 }
 0x19c   : > { %v857_v16 = vsel %vm741_vm3, %v852_v14, 0  ;;  %v967_v18 = vsel %vm741_vm3, %v962_v17, 0 }
 0x19f   : > { %v1072_v19 = vpop.permute.xlu1 %1071  ;;  %v960_v20 = vpop.permute.xlu0 %959 }
 0x1a0   : > { %1791 = vmatmul.mubr.msk.bf16.vlgmr.msra.gmra.mxu1 %vm741_vm3, %v2389_v9  ;;  %v1077_v21 = vsel %vm741_vm3, %v1072_v19, 0 }
 0x1a1   : > { %1801 = vmatpush3.bf16.xpose.msra.mxu1 %v857_v16  ;;  %1802 = vmatprep.mubr.msk.bf16.mxu1 %vm2116_vm1, %v2115_v2 }
 0x1a2   : > { %1812 = vmatprep.subr.bf16.mxu1 %v2115_v2 }
 0x1a3   : > { %v1070_v22 = vpop.permute.xlu0 %1069 }
 0x1a8   : > { %1803 = vmatmul.mubr.msk.bf16.vlgmr.msra.gmra.mxu1 %vm741_vm3, %v850_v15 }
 0x1a9   : > { %1813 = vmatpush3.bf16.xpose.msra.mxu1 %v967_v18  ;;  %1814 = vmatprep.mubr.msk.bf16.mxu1 %vm2116_vm1, %v2115_v2 }
 0x1aa   : > { %1824 = vmatprep.subr.bf16.mxu1 %v2115_v2 }
 0x1b0   : > { %1815 = vmatmul.mubr.msk.bf16.vlgmr.msra.gmra.mxu1 %vm741_vm3, %v960_v20 }
 0x1b1   : > { %1825 = vmatpush3.bf16.xpose.msra.mxu1 %v1077_v21  ;;  %1826 = vmatprep.mubr.msk.bf16.mxu1 %vm2116_vm1, %v2115_v2 }
 0x1b2   : > { %1836 = vmatprep.subr.bf16.mxu1 %v2115_v2 }
 0x1b8   : > { %1827 = vmatmul.mubr.msk.bf16.vlgmr.msra.gmra.mxu1 %vm741_vm3, %v1070_v22 }
 0x1b9   : > { %1840 = vmatprep.mubr.msk.bf16.mxu1 %vm2116_vm1, %v2115_v2 }
 0x260   : > { %v782_v23 = vpop.f32.mrf.mxu1 }
 0x261   : > { %v788_v24 = vsel %vm741_vm3, %v782_v23, -inf }
 0x262   : > { %789 = vmax.xlane.f32.xlu1 %v788_v24  ;;  %v1792_v25 = vpop.f32.mrf.mxu1 }
 0x264   : > { %v785_v26 = vpop.f32.mrf.mxu1 }
 0x266   : > { %v1793_v27 = vpop.f32.mrf.mxu1 }
 0x268   : > { %v893_v28 = vpop.f32.mrf.mxu1 }
 0x269   : > { %v899_v29 = vsel %vm741_vm3, %v893_v28, -inf }
 0x26a   : > { %900 = vmax.xlane.f32.xlu0 %v899_v29  ;;  %v1804_v30 = vpop.f32.mrf.mxu1 }
 0x26c   : > { %v896_v31 = vpop.f32.mrf.mxu1 }
 0x26e   : > { %v1805_v32 = vpop.f32.mrf.mxu1 }
 0x270   : > { %v1003_v33 = vpop.f32.mrf.mxu1 }
 0x271   : > { %v1009_v34 = vsel %vm741_vm3, %v1003_v33, -inf }
 0x272   : > { %1010 = vmax.xlane.f32.xlu0 %v1009_v34  ;;  %v1816_v35 = vpop.f32.mrf.mxu1  ;;  %v1961_v34 = vld [vmem:[%s2324_s0] sm:$0xff]  }
 0x274   : > { %v1006_v36 = vpop.f32.mrf.mxu1 }
 0x276   : > { %v1817_v37 = vpop.f32.mrf.mxu1 }
 0x278   : > { %v1113_v38 = vpop.f32.mrf.mxu1 }
 0x279   : > { %v1119_v39 = vsel %vm741_vm3, %v1113_v38, -inf }
 0x27a   : > { %1120 = vmax.xlane.f32.xlu1 %v1119_v39  ;;  %v1828_v40 = vpop.f32.mrf.mxu1 }
 0x27c   : > { %v1116_v41 = vpop.f32.mrf.mxu1 }
 0x27e   : > { %v1829_v42 = vpop.f32.mrf.mxu1 }
 0x2eb   : > { %v790_v43 = vpop.xlane.xlu1 %789 }
 0x2ec   : > { %v791_v44 = vsub.f32 %v782_v23, %v790_v43 }
 0x2ee   : > { %v792_v45 = vmul.f32 1.442695, %v791_v44 }
 0x2f0   : > { %1968 = vpow2.f32 %v792_v45 }
 0x2f3   : > { %v901_v46 = vpop.xlane.xlu0 %900 }
 0x2f4   : > { %v902_v47 = vsub.f32 %v893_v28, %v901_v46 }
 0x2f6   : > { %v903_v48 = vmul.f32 1.442695, %v902_v47 }
 0x2f8   : > { %1970 = vpow2.f32 %v903_v48 }
 0x2fb   : > { %v1011_v49 = vpop.xlane.xlu0 %1010 }
 0x2fc   : > { %v1012_v50 = vsub.f32 %v1003_v33, %v1011_v49  ;;  %v1960_v33 = vld [vmem:[%s2324_s0 + $0x8] sm:$0xff]  }
 0x2fd   : > { %v1969_v51 = vpop.eup %1968  ;;  %1837 = vmatpush3.bf16.msra.mxu1 %v1960_v33 }
 0x2fe   : > { %v1013_v52 = vmul.f32 1.442695, %v1012_v50  ;;  %v794_v53 = vsel %vm741_vm3, %v1969_v51, 0.0  ;;  %1838 = vmatprep.subr.bf16.mxu1 %v2115_v2  ;;  %v1724_v50 = vld [vmem:[%s2622_s5] ss:$0 sm:$0xff] }
 0x2ff   : > { %795 = vadd.xlane.f32.xlu0 %v794_v53 }
 0x300   : > { %1972 = vpow2.f32 %v1013_v52 }
 0x301   : > { %1839 = vmatpush3.bf16.msra.mxu1 %v1961_v34 }
 0x302   : > { %1852 = vmatprep.subr.bf16.mxu1 %v2115_v2 }
 0x303   : > { %v1121_v58 = vpop.xlane.xlu1 %1120 }
 0x304   : > { %v1122_v59 = vsub.f32 %v1113_v38, %v1121_v58 }
 0x305   : > { %v1971_v54 = vpop.eup %1970 }
 0x306   : > { %v905_v55 = vsel %vm741_vm3, %v1971_v54, 0.0  ;;  %v1123_v60 = vmul.f32 1.442695, %v1122_v59 }
 0x307   : > { %906 = vadd.xlane.f32.xlu1 %v905_v55 }
 0x308   : > { %1974 = vpow2.f32 %v1123_v60 }
 0x30d   : > { %v1973_v56 = vpop.eup %1972 }
 0x30e   : > { %v1015_v57 = vsel %vm741_vm3, %v1973_v56, 0.0 }
 0x30f   : > { %1016 = vadd.xlane.f32.xlu0 %v1015_v57 }
 0x315   : > { %v1975_v61 = vpop.eup %1974 }
 0x316   : > { %v1125_v62 = vsel %vm741_vm3, %v1975_v61, 0.0 }
 0x318   : > { %911 = vrot.lane.b32.xlu1 %v2389_v9, %s2124_s17 }
 0x325   : > { %800 = vrot.lane.b32.xlu0 %v2389_v9, %s2125_s18 }
 0x329   : > { %1131 = vrot.lane.b32.xlu0 %v2389_v9, %s2126_s12 }
 0x33c   : > { %1126 = vadd.xlane.f32.xlu1 %v1125_v62 }
 0x34d   : > { %1021 = vrot.lane.b32.xlu1 %v2389_v9, %s2127_s19 }
 0x388   : > { %v796_v63 = vpop.xlane.xlu0 %795 }
 0x389   : > { %1976 = vrcp.f32 %v796_v63 }
 0x390   : > { %v907_v0 = vpop.xlane.xlu1 %906 }
 0x391   : > { %1978 = vrcp.f32 %v907_v0  ;;  %v1963_v0 = vld [vmem:[%s2333_s15] sm:$0xff]  }
 0x394   : > { %v912_v8 = vpop.permute.xlu1 %911 }
 0x395   : > { %v917_v12 = vsel %vm805_vm4, %v912_v8, 0 }
 0x396   : > { %v1977_v1 = vpop.eup %1976 }
 0x397   : > { %v798_v5 = vmul.f32 %v1977_v1, %v1969_v51  ;;  %v669_v51 = vunpack.c.l.bf16 %v2377_v4  ;;  %v1962_v4 = vld [vmem:[%s2333_s15 + $0x8] sm:$0xff]   ;;  %v1964_v1 = vld [vmem:[%s2343_s11 + $0x18] sm:$0xff]  }
 0x398   : > { %v1017_v3 = vpop.xlane.xlu0 %1016 }
 0x399   : > { %v799_v10 = vpack.c.bf16 %v798_v5, %v798_v5  ;;  %1980 = vrcp.f32 %v1017_v3  ;;  %v1965_v3 = vld [vmem:[%s2343_s11 + $0x10] sm:$0xff]  }
 0x39c   : > { %v801_v6 = vpop.permute.xlu0 %800 }
 0x39d   : > { %v807_v7 = vsel %vm805_vm4, %v801_v6, 0 }
 0x39e   : > { %1795 = vmatpush3.bf16.msra.mxu0 %v807_v7  ;;  %v1979_v11 = vpop.eup %1978 }
 0x39f   : > { %1806 = vmatprep.subr.bf16.mxu0 %v2115_v2  ;;  %v909_v9 = vmul.f32 %v1979_v11, %v1971_v54 }
 0x3a0   : > { %v1132_v19 = vpop.permute.xlu0 %1131 }
 0x3a1   : > { %1797 = vmatmul.mubr.msk.bf16.vlgmr.msra.gmra.mxu0 %vm741_vm3, %v799_v10  ;;  %v910_v13 = vpack.c.bf16 %v909_v9, %v909_v9  ;;  %v1137_v21 = vsel %vm805_vm4, %v1132_v19, 0  ;;  %v1728_v10 = vld [vmem:[%s650_s26] ss:$0 sm:$0xff] }
 0x3a2   : > { %1807 = vmatpush3.bf16.msra.mxu0 %v917_v12  ;;  %1808 = vmatprep.mubr.msk.bf16.mxu0 %vm2116_vm1, %v2115_v2  ;;  %v1729_v12 = vld [vmem:[%s653_s23] ss:$0 sm:$0xff] }
 0x3a3   : > { %1818 = vmatprep.subr.bf16.mxu0 %v2115_v2 }
 0x3a6   : > { %v1981_v14 = vpop.eup %1980 }
 0x3a7   : > { %v1019_v16 = vmul.f32 %v1981_v14, %v1973_v56 }
 0x3a9   : > { %1809 = vmatmul.mubr.msk.bf16.vlgmr.msra.gmra.mxu0 %vm741_vm3, %v910_v13  ;;  %v1020_v20 = vpack.c.bf16 %v1019_v16, %v1019_v16  ;;  %v1967_v16 = vld [vmem:[%s2343_s11] sm:$0xff]  }
 0x3aa   : > { %1820 = vmatprep.mubr.msk.bf16.mxu0 %vm2116_vm1, %v2115_v2 }
 0x3c5   : > { %v1127_v15 = vpop.xlane.xlu1 %1126 }
 0x3c6   : > { %1982 = vrcp.f32 %v1127_v15  ;;  %v1966_v15 = vld [vmem:[%s2343_s11 + $0x8] sm:$0xff]   ;;  %s2626_s11 = sld [smem:[#allocation11_spill]] }
 0x3c9   : > { %v1022_v17 = vpop.permute.xlu1 %1021 }
 0x3ca   : > { %v1027_v18 = vsel %vm805_vm4, %v1022_v17, 0  ;;  %v1730_v17 = vld [vmem:[%s2625_s25] ss:$0 sm:$0xff] }
 0x3cb   : > { %1819 = vmatpush3.bf16.msra.mxu0 %v1027_v18 }
 0x3cc   : > { %1830 = vmatprep.subr.bf16.mxu0 %v2115_v2  ;;  %s1743_s0 = sshll.u32 %s2626_s11, 6 }
 0x3cd   : > { %s1491_s27 = scalar_lea.hbm %s2631_s6, %s1743_s0 }
 0x3ce   : > { %1821 = vmatmul.mubr.msk.bf16.vlgmr.msra.gmra.mxu0 %vm741_vm3, %v1020_v20 }
 0x3cf   : > { %1831 = vmatpush3.bf16.msra.mxu0 %v1137_v21  ;;  %1832 = vmatprep.mubr.msk.bf16.mxu0 %vm2116_vm1, %v2115_v2 }
 0x3d0   : > { %1844 = vmatprep.subr.bf16.mxu0 %v2115_v2 }
 0x3d3   : > { %v1983_v22 = vpop.eup %1982 }
 0x3d4   : > { %v1129_v23 = vmul.f32 %v1983_v22, %v1975_v61 }
 0x3d6   : > { %v1130_v24 = vpack.c.bf16 %v1129_v23, %v1129_v23 }
 0x3d8   : > { %1833 = vmatmul.mubr.msk.bf16.vlgmr.msra.gmra.mxu0 %vm741_vm3, %v1130_v24 }
 0x3d9   : > { %1848 = vmatprep.mubr.msk.bf16.mxu0 %vm2116_vm1, %v2115_v2  ;;  %1845 = vmatpush3.bf16.msra.mxu0 %v1962_v4 }
 0x3da   : > { %1846 = vmatprep.subr.bf16.mxu0 %v2115_v2 }
 0x3dd   : > { %1847 = vmatpush3.bf16.msra.mxu0 %v1963_v0 }
 0x461   : > { %v843_v25 = vpop.f32.mrf.mxu0 }
 0x463   : > { %v1798_v26 = vpop.f32.mrf.mxu0 }
 0x465   : > { %v846_v27 = vpop.f32.mrf.mxu0 }
 0x467   : > { %v1799_v28 = vpop.f32.mrf.mxu0 }
 0x469   : > { %v953_v29 = vpop.f32.mrf.mxu0 }
 0x46a   : > { %1180 = vrot.lane.b32.xlu1 %v953_v29, %s2128_s24 }
 0x46b   : > { %v1810_v30 = vpop.f32.mrf.mxu0 }
 0x46d   : > { %v956_v31 = vpop.f32.mrf.mxu0 }
 0x46f   : > { %v1811_v32 = vpop.f32.mrf.mxu0 }
 0x48e   : > { %v1063_v35 = vpop.f32.mrf.mxu0 }
 0x48f   : > { %1184 = vrot.lane.b32.xlu0 %v1063_v35, %s2129_s1 }
 0x490   : > { %v1822_v36 = vpop.f32.mrf.mxu0 }
 0x492   : > { %v1066_v37 = vpop.f32.mrf.mxu0 }
 0x494   : > { %v1823_v38 = vpop.f32.mrf.mxu0 }
 0x498   : > { %v1173_v39 = vpop.f32.mrf.mxu0 }
 0x499   : > { %1188 = vrot.lane.b32.xlu1 %v1173_v39, %s2130_s20 }
 0x49a   : > { %v1834_v40 = vpop.f32.mrf.mxu0 }
 0x49c   : > { %v1176_v41 = vpop.f32.mrf.mxu0 }
 0x49d   : > { %v1740_v41 = vld [vmem:[%s656_s29] ss:$0 sm:$0xff]  ;;  %s2016_s29 = scalar_lea.vmem %s1494_s3, 64 }
 0x49e   : > { %v1835_v42 = vpop.f32.mrf.mxu0  ;;  %p2017_p11 = scmp.ne.s32.totalorder %s1494_s3, %s2016_s29 }
 0x4a0   : > { %p2018_p1 = pnand %p2017_p11, %p2265_p10 }
 0x4a2   : > { %p2019_p2 = pneg %p2018_p1 }
 0x4dc   : > { %v1181_v43 = vpop.permute.xlu1 %1180 }
 0x4dd   : > { %v1191_v45 = vsel %vm741_vm3, %v843_v25, %v1181_v43  ;;  %v1741_v43 = vld [vmem:[%s659_s13] ss:$0 sm:$0xff]  ;;  %s2020_s13 = sshll.u32 %s2131_s10, 4  ;;  %s2021_s13 = int_to_ptr.vmem [resolvable:$false] %s2020_s13 }
 0x4de   : > { %s2022_s30 = scalar_lea.vmem %s2021_s13, 128  ;;  %p2023_p4 = scmp.lt.s32.totalorder %s1494_s3, %s2021_s13 }
 0x4df   : > { %p2024_p5 = scmp.lt.s32.totalorder %s2022_s30, %s2016_s29 }
 0x4e1   : > { %p2025_p6 = por %p2024_p5, %p2023_p4 }
 0x4e3   : > { %p2026_p7 = pnand %p2025_p6, %p2019_p2 }
 0x501   : > { %v1185_v44 = vpop.permute.xlu0 %1184 }
 0x502   : > { %v1193_v46 = vsel %vm1192_vm5, %v1191_v45, %v1185_v44 }
 0x50b   : > { %v1189_v47 = vpop.permute.xlu1 %1188 }
 0x50c   : > { %v1195_v48 = vsel %vm1194_vm6, %v1193_v46, %v1189_v47 }
 0x50d   : > { %v1196_v49 = vpack.c.bf16 %v1195_v48, %v1195_v48 }
 0x50f   : > { %1841 = vmatmul.mubr.msk.bf16.vlgmr.msra.gmra.mxu1 %vm693_vm2, %v1196_v49 }
 0x510   : > { %1860 = vmatprep.mubr.msk.bf16.mxu1 %vm2116_vm1, %v2115_v2  ;;  %1853 = vmatpush3.bf16.msra.mxu1 %v1964_v1 }
 0x511   : > { %1854 = vmatprep.subr.bf16.mxu1 %v2115_v2 }
 0x514   : > { %1855 = vmatpush3.bf16.msra.mxu1 %v1965_v3 }
 0x515   : > { %1856 = vmatprep.subr.bf16.mxu1 %v2115_v2 }
 0x518   : > { %1857 = vmatpush3.bf16.msra.mxu1 %v1966_v15 }
 0x519   : > { %1858 = vmatprep.subr.bf16.mxu1 %v2115_v2  ;;  %v1734_v2 = vld [vmem:[%s647_s14] ss:$0 sm:$0xff]  ;;  %s2627_s14 = sld [smem:[#allocation20_spill]] }
 0x51c   : > { %1859 = vmatpush3.bf16.msra.mxu1 %v1967_v16 }
 0x51f   : > { %s1480_s28 = scalar_lea.sflag [#allocation4], %s2627_s14 }
 0x5cf   : > { %v1257_v52 = vpop.f32.mrf.mxu1 }
 0x5d0   : > { %v1258_v53 = vadd.f32 %v1724_v50, %v1257_v52 }
 0x5d1   : > { %v1842_v54 = vpop.f32.mrf.mxu1 }
 0x5d2   : > { %v1263_v55 = vadd.f32 %v1258_v53, %v669_v51 }
 0x5d3   : > { %v1260_v56 = vpop.f32.mrf.mxu1 }
 0x5d4   : > { %v1266_v57 = vsel %vm693_vm2, %v1263_v55, 0.0 }
 0x5d5   : > { %v1843_v58 = vpop.f32.mrf.mxu1  ;;  %1267 = vadd.xlane.f32.xlu0 %v1266_v57 }
 0x65e   : > { %v1268_v59 = vpop.xlane.xlu0 %1267 }
 0x65f   : > { %v1270_v60 = vmul.f32 0.03125, %v1268_v59 }
 0x661   : > { %v1271_v61 = vsub.f32 %v1263_v55, %v1270_v60 }
 0x663   : > { %v1272_v62 = vmul.f32 %v1271_v61, %v1271_v61 }
 0x665   : > { %v1273_v63 = vsel %vm693_vm2, %v1272_v62, 0.0 }
 0x666   : > { %1274 = vadd.xlane.f32.xlu1 %v1273_v63 }
 0x6ef   : > { %v1275_v5 = vpop.xlane.xlu1 %1274 }
 0x6f0   : > { %v1276_v6 = vmul.f32 0.03125, %v1275_v5 }
 0x6f2   : > { %v1277_v7 = vadd.f32 1e-05, %v1276_v6 }
 0x6f4   : > { %1984 = vrsqrt.f32 %v1277_v7 }
 0x701   : > { %v1985_v8 = vpop.eup %1984 }
 0x702   : > { %v1279_v11 = vmul.f32 %v1985_v8, %v1271_v61 }
 0x704   : > { %v1286_v9 = vmul.f32 %v1728_v10, %v1279_v11 }
 0x706   : > { %v1293_v13 = vadd.f32 %v1729_v12, %v1286_v9 }
 0x708   : > { %v1294_v14 = vpack.c.bf16 %v1293_v13, %v1293_v13 }
 0x70a   : > { %1849 = vmatmul.mubr.msk.bf16.vlgmr.msra.gmra.mxu0 %vm693_vm2, %v1294_v14 }
 0x7ca   : > { %v1355_v18 = vpop.f32.mrf.mxu0 }
 0x7cb   : > { %v1356_v19 = vadd.f32 %v1730_v17, %v1355_v18 }
 0x7cc   : > { %v1850_v20 = vpop.f32.mrf.mxu0 }
 0x7cd   : > { %v1361_v21 = vmax.f32 %v1356_v19, 0.0 }
 0x7ce   : > { %v1358_v22 = vpop.f32.mrf.mxu0 }
 0x7cf   : > { %v1362_v23 = vpack.c.bf16 %v1361_v21, %v1361_v21 }
 0x7d0   : > { %v1851_v24 = vpop.f32.mrf.mxu0 }
 0x7d1   : > { %1861 = vmatmul.mubr.msk.bf16.vlgmr.msra.gmra.mxu1 %vm1402_vm7, %v1362_v23 }
 0x891   : > { %v1440_v25 = vpop.f32.mrf.mxu1 }
 0x892   : > { %v1441_v26 = vadd.f32 %v1734_v2, %v1440_v25 }
 0x893   : > { %v1862_v27 = vpop.f32.mrf.mxu1 }
 0x894   : > { %v1446_v28 = vadd.f32 %v1441_v26, %v1293_v13 }
 0x895   : > { %v1443_v29 = vpop.f32.mrf.mxu1 }
 0x896   : > { %v1449_v30 = vsel %vm693_vm2, %v1446_v28, 0.0 }
 0x897   : > { %1450 = vadd.xlane.f32.xlu0 %v1449_v30  ;;  %v1863_v31 = vpop.f32.mrf.mxu1 }
 0x920   : > { %v1451_v32 = vpop.xlane.xlu0 %1450 }
 0x921   : > { %v1452_v33 = vmul.f32 0.03125, %v1451_v32 }
 0x923   : > { %v1453_v34 = vsub.f32 %v1446_v28, %v1452_v33 }
 0x925   : > { %v1454_v35 = vmul.f32 %v1453_v34, %v1453_v34 }
 0x927   : > { %v1455_v36 = vsel %vm693_vm2, %v1454_v35, 0.0 }
 0x928   : > { %1456 = vadd.xlane.f32.xlu0 %v1455_v36 }
 0x9b1   : > { %v1457_v37 = vpop.xlane.xlu0 %1456 }
 0x9b2   : > { %v1458_v38 = vmul.f32 0.03125, %v1457_v37 }
 0x9b4   : > { %v1459_v39 = vadd.f32 1e-05, %v1458_v38 }
 0x9b6   : > { %1986 = vrsqrt.f32 %v1459_v39 }
 0x9c3   : > { %v1987_v40 = vpop.eup %1986 }
 0x9c4   : > { %v1461_v42 = vmul.f32 %v1987_v40, %v1453_v34 }
 0x9c6   : > { %v1468_v44 = vmul.f32 %v1740_v41, %v1461_v42 }
 0x9c8   : > { %v1475_v45 = vadd.f32 %v1741_v43, %v1468_v44 }
 0x9ca   : > { %v1476_v46 = vpack.c.bf16 %v1475_v45, %v1475_v45 }
 0x9cc   : > { %1478 = vst.msk [vmem:[%s2365_s7] sm:$0xf] %vm1477_vm8, %v1476_v46 }
 0x9cd   : > { %2029 = shalt.err (!%p2026_p7)
}
 0x9ce   : > { %s2030_s16 = scalar_lea.hbm %s1491_s27, 64  ;;  %s2034_s22 = scalar_lea.hbm %s2631_s6, 128 }
 0x9cf   : > { %p2031_p8 = scmp.ne.s32.totalorder %s1491_s27, %s2030_s16  ;;  %p2035_p13 = scmp.lt.s32.totalorder %s1491_s27, %s2631_s6 }
 0x9d0   : > { %p2036_p0 = scmp.lt.s32.totalorder %s2034_s22, %s2030_s16 }
 0x9d1   : > { %p2032_p12 = pnand %p2031_p8, %p2265_p10 }
 0x9d2   : > { %p2037_p9 = por %p2036_p0, %p2035_p13 }
 0x9d3   : > { %p2033_p3 = pneg %p2032_p12 }
 0x9d5   : > { %p2038_p11 = pnand %p2037_p9, %p2033_p3 }
 0x9d7   : > { %2041 = shalt.err (!%p2038_p11)
}
 0x9d8   : > { %1866 = dma.vmem_to_hbm [thread:$0]  (%p2265_p10), %s1494_s3, 64, %s1491_s27, %s1480_s28  }
 0x9d9 PF: > { %s2632_s21 = sld [smem:[#allocation14_spill]] }
 0x9da   : > { %s2633_s11 = sld [smem:[#allocation8_spill]] }
 0x9db   : > { %s2634_s14 = sld [smem:[#allocation18_spill]] }
 0x9df   : > { %p1877_p1 = scmp.ge.s32.totalorder %s2632_s21, 2 }
 0x9e0   : > { %s1505_s17 = sand.u32 1, %s2633_s11  }
 0x9e1   : > { %p2635_p2 = scmp.ne.s32.totalorder %s2634_s14, 0  ;;  %s1506_s18 = scalar_lea.sflag [#allocation4], %s1505_s17 }
 0x9e3   : > { %p1873_p4 = pnand %p1877_p1, %p2635_p2 }
 0x9e5   : > { %p1874_p5 = pneg %p1873_p4 }
 0x9e7   : > { %2079 = dma.done.wait (%p1874_p5), %s1506_s18, 64  }
 0x9e8   : > { %2081 = vsyncadd (%p1874_p5), %s1506_s18, 4294967232  ;;  %s29_s15 = sadd.s32 1, %s2632_s21   ;;  %s2636_s25 = sld [smem:[#allocation9_spill]] }
 0x9e9   : > { %p26_p6 = scmp.ge.s32.totalorder %s29_s15, 6   ;;  %s2637_s26 = sld [smem:[#allocation10_spill]] }
 0x9ea   : > { %s2638_s27 = sld [smem:[#allocation19_spill]] }
 0x9eb   : > { %s2639_s28 = sld [smem:[#allocation12_spill]]  ;;  %28 = sbr.rel (!%p26_p6) target bundleno = 18 (0x12), region = 157 }
 0x9ec   : > { %s2640_s29 = sld [smem:[#allocation13_spill]] }
 0x9ed   : > { %s2641_s30 = sld [smem:[#allocation15_spill]] }
 0x9ee   : > { %s2642_s14 = sld [smem:[#allocation16_spill]] }
 0x9f0   :  { %1511 = vsyncpa [#allocation3], 1 }
 0x9f1   :  { %1513 = vsyncpa [#allocation3 + $0x1], 1 }
 0x9f2   :  { %1514 = vsyncpa [#allocation4], 1 }
 0x9f3   :  { %1516 = vsyncpa [#allocation4 + $0x1], 1 }

</bundles_post_ra>
